<compile_context>
chip_gen: v7x
topology: tpu7x:2x2x1
jax: 0.10.0
libtpu: 0.0.40
codegen_flags: <defaults>
</compile_context>

<pallas_src>
import jax
import jax.numpy as jnp
from jax.experimental import pallas as pl
from jax.experimental.pallas import tpu as pltpu

LANE = 128
SUBLANE = 8


def _round_up(n, m):
    return ((n + m - 1) // m) * m


# ---------------------------------------------------------------------------
# Kernel
# ---------------------------------------------------------------------------
def actor_fwd_kernel(x_ref, w1_ref, b1_ref, w2_ref, b2_ref, wh_ref, bh_ref,
                     mean_ref, std_ref):
    a_p = mean_ref.shape[-1]                       # padded per-head width (128)

    x = x_ref[...]                                 # (TB, SD_P) bf16
    # fc1 + ReLU
    h1 = jnp.dot(x, w1_ref[...], preferred_element_type=jnp.float32) + b1_ref[...]
    h1 = jnp.maximum(h1, 0.0)
    # fc2 + ReLU
    h2 = jnp.dot(h1.astype(jnp.bfloat16), w2_ref[...],
                 preferred_element_type=jnp.float32) + b2_ref[...]
    h2 = jnp.maximum(h2, 0.0)
    # fused mean | log_std head: one (TB, 2*A_P) matmul
    head = jnp.dot(h2.astype(jnp.bfloat16), wh_ref[...],
                   preferred_element_type=jnp.float32) + bh_ref[...]
    mean_ref[...] = head[:, :a_p]
    log_std = jnp.clip(head[:, a_p:], -20.0, 2.0)
    std_ref[...] = jnp.exp(log_std)


# ---------------------------------------------------------------------------
# Wrapper
# ---------------------------------------------------------------------------
def actor_forward(x, packed, action_dim, *, block_b=256):
    """x: (B, state_dim) f32.  packed: output of pack_actor_params.
    Returns (mean, std), each (B, action_dim) f32."""
    B, state_dim = x.shape
    sd_p, h_p = packed["w1"].shape
    a_p = packed["wh"].shape[1] // 2

    # batch tile: >=8 (sublane), <=block_b; pad batch up to a multiple of it
    tb = min(block_b, _round_up(B, SUBLANE))
    b_pad = _round_up(B, tb)

    xp = jnp.zeros((b_pad, sd_p), jnp.bfloat16)
    xp = xp.at[:B, :state_dim].set(x.astype(jnp.bfloat16))

    row_spec = lambda shape: pl.BlockSpec(shape, lambda i: (i, 0))
    const_spec = lambda shape: pl.BlockSpec(shape, lambda i: (0, 0))

    mean_p, std_p = pl.pallas_call(
        actor_fwd_kernel,
        grid=(b_pad // tb,),
        out_shape=(
            jax.ShapeDtypeStruct((b_pad, a_p), jnp.float32),
            jax.ShapeDtypeStruct((b_pad, a_p), jnp.float32),
        ),
        in_specs=[
            row_spec((tb, sd_p)),                    # x (tiled over batch)
            const_spec((sd_p, h_p)), const_spec((1, h_p)),   # w1, b1 (resident)
            const_spec((h_p, h_p)), const_spec((1, h_p)),    # w2, b2
            const_spec((h_p, 2 * a_p)), const_spec((1, 2 * a_p)),  # fused head
        ],
        out_specs=(row_spec((tb, a_p)), row_spec((tb, a_p))),
        compiler_params=pltpu.CompilerParams(
            dimension_semantics=("parallel",)),
    )(xp, packed["w1"], packed["b1"], packed["w2"], packed["b2"],
      packed["wh"], packed["bh"])

    return mean_p[:B, :action_dim], std_p[:B, :action_dim]


# ---------------------------------------------------------------------------
# Params (PyTorch-equivalent init) and packing into padded/fused bf16 layout
# ---------------------------------------------------------------------------
def xavier_uniform(key, fan_in, fan_out):
    bound = jnp.sqrt(6.0 / (fan_in + fan_out))
    return jax.random.uniform(key, (fan_in, fan_out), jnp.float32, -bound, bound)


def init_actor_params(key, state_dim, action_dim, hidden=64):
    k1, k2, k3, k4 = jax.random.split(key, 4)
    return {
        # weights stored (in, out) so every layer is y = x @ W + b
        "w1": xavier_uniform(k1, state_dim, hidden),
        "b1": jnp.zeros((hidden,), jnp.float32),
        "w2": xavier_uniform(k2, hidden, hidden),
        "b2": jnp.zeros((hidden,), jnp.float32),
        "wm": xavier_uniform(k3, hidden, action_dim),
        "bm": jnp.zeros((action_dim,), jnp.float32),
        "wls": xavier_uniform(k4, hidden, action_dim),
        "bls": jnp.zeros((action_dim,), jnp.float32),
    }


def pack_actor_params(params):
    state_dim, hidden = params["w1"].shape
    action_dim = params["wm"].shape[1]
    sd_p = _round_up(state_dim, LANE)
    h_p = _round_up(hidden, LANE)
    a_p = _round_up(action_dim, LANE)

    w1 = jnp.zeros((sd_p, h_p), jnp.float32).at[:state_dim, :hidden].set(params["w1"])
    b1 = jnp.zeros((1, h_p), jnp.float32).at[0, :hidden].set(params["b1"])
    w2 = jnp.zeros((h_p, h_p), jnp.float32).at[:hidden, :hidden].set(params["w2"])
    b2 = jnp.zeros((1, h_p), jnp.float32).at[0, :hidden].set(params["b2"])
    # fused head: columns [0, action_dim) -> mean, [a_p, a_p+action_dim) -> log_std
    wh = jnp.zeros((h_p, 2 * a_p), jnp.float32)
    wh = wh.at[:hidden, :action_dim].set(params["wm"])
    wh = wh.at[:hidden, a_p:a_p + action_dim].set(params["wls"])
    bh = jnp.zeros((1, 2 * a_p), jnp.float32)
    bh = bh.at[0, :action_dim].set(params["bm"])
    bh = bh.at[0, a_p:a_p + action_dim].set(params["bls"])

    return {
        "w1": w1.astype(jnp.bfloat16), "b1": b1,
        "w2": w2.astype(jnp.bfloat16), "b2": b2,
        "wh": wh.astype(jnp.bfloat16), "bh": bh,
    }


# ---------------------------------------------------------------------------
if __name__ == "__main__":
    key = jax.random.PRNGKey(0)
    kp, kx = jax.random.split(key)

    B, state_dim, action_dim = 2, 32, 8
    params = init_actor_params(kp, state_dim, action_dim)
    packed = pack_actor_params(params)
    x = jax.random.normal(kx, (B, state_dim), jnp.float32)

    mean, std = actor_forward(x, packed, action_dim)
    jax.block_until_ready((mean, std))
    assert mean.shape == (B, action_dim) and std.shape == (B, action_dim)

    # Reference 1: exact same padded/bf16 math as the kernel (tight tolerance).
    def ref_bf16(x, pk):
        sd_p = pk["w1"].shape[0]
        a_p = pk["wh"].shape[1] // 2
        xb = jnp.zeros((x.shape[0], sd_p), jnp.bfloat16)
        xb = xb.at[:, :x.shape[1]].set(x.astype(jnp.bfloat16))
        h1 = jnp.maximum(
            jnp.dot(xb, pk["w1"], preferred_element_type=jnp.float32) + pk["b1"], 0.0)
        h2 = jnp.maximum(
            jnp.dot(h1.astype(jnp.bfloat16), pk["w2"],
                    preferred_element_type=jnp.float32) + pk["b2"], 0.0)
        head = jnp.dot(h2.astype(jnp.bfloat16), pk["wh"],
                       preferred_element_type=jnp.float32) + pk["bh"]
        m = head[:, :action_dim]
        ls = jnp.clip(head[:, a_p:a_p + action_dim], -20.0, 2.0)
        return m, jnp.exp(ls)

    m_ref, s_ref = ref_bf16(x, packed)
    assert jnp.allclose(mean, m_ref, atol=1e-3, rtol=1e-3), "mean mismatch (bf16 ref)"
    assert jnp.allclose(std, s_ref, atol=1e-3, rtol=1e-3), "std mismatch (bf16 ref)"

    # Reference 2: original f32 PyTorch semantics (loose tolerance: bf16 matmuls).
    def ref_f32(x, p):
        h1 = jnp.maximum(x @ p["w1"] + p["b1"], 0.0)
        h2 = jnp.maximum(h1 @ p["w2"] + p["b2"], 0.0)
        m = h2 @ p["wm"] + p["bm"]
        ls = jnp.clip(h2 @ p["wls"] + p["bls"], -20.0, 2.0)
        return m, jnp.exp(ls)

    m32, s32 = ref_f32(x, params)
    assert jnp.allclose(mean, m32, atol=5e-2, rtol=5e-2), "mean mismatch (f32 ref)"
    assert jnp.allclose(std, s32, atol=5e-2, rtol=5e-2), "std mismatch (f32 ref)"

    print("KERNEL_OK")
</pallas_src>

<mosaic_0001>
module attributes {stable_mosaic.version = 11 : i64} {
  func.func @actor_fwd_kernel(%arg0: i32, %arg1: memref<8x128xbf16, #tpu.memory_space<vmem>>, %arg2: memref<128x128xbf16, #tpu.memory_space<vmem>>, %arg3: memref<1x128xf32, #tpu.memory_space<vmem>>, %arg4: memref<128x128xbf16, #tpu.memory_space<vmem>>, %arg5: memref<1x128xf32, #tpu.memory_space<vmem>>, %arg6: memref<128x256xbf16, #tpu.memory_space<vmem>>, %arg7: memref<1x256xf32, #tpu.memory_space<vmem>>, %arg8: memref<8x128xf32, #tpu.memory_space<vmem>>, %arg9: memref<8x128xf32, #tpu.memory_space<vmem>>) attributes {dimension_semantics = [#tpu.dimension_semantics<parallel>], iteration_bounds = array<i64: 1>, scalar_prefetch = 0 : i64, scratch_operands = 0 : i64, tpu.core_type = #tpu.core_type<tc>, window_params = [{transform_indices = @transform_0, window_bounds = array<i64: 8, 128>}, {pipeline_mode = #tpu.pipeline_mode<synchronous>, transform_indices = @transform_1, window_bounds = array<i64: 128, 128>}, {pipeline_mode = #tpu.pipeline_mode<synchronous>, transform_indices = @transform_2, window_bounds = array<i64: 1, 128>}, {pipeline_mode = #tpu.pipeline_mode<synchronous>, transform_indices = @transform_3, window_bounds = array<i64: 128, 128>}, {pipeline_mode = #tpu.pipeline_mode<synchronous>, transform_indices = @transform_4, window_bounds = array<i64: 1, 128>}, {pipeline_mode = #tpu.pipeline_mode<synchronous>, transform_indices = @transform_5, window_bounds = array<i64: 128, 256>}, {pipeline_mode = #tpu.pipeline_mode<synchronous>, transform_indices = @transform_6, window_bounds = array<i64: 1, 256>}, {transform_indices = @transform_7, window_bounds = array<i64: 8, 128>}, {transform_indices = @transform_8, window_bounds = array<i64: 8, 128>}]} {
    %c0 = arith.constant 0 : index
    %c0_0 = arith.constant 0 : index
    %0 = vector.load %arg1[%c0, %c0_0] : memref<8x128xbf16, #tpu.memory_space<vmem>>, vector<8x128xbf16>
    %c0_1 = arith.constant 0 : index
    %c0_2 = arith.constant 0 : index
    %1 = vector.load %arg2[%c0_1, %c0_2] : memref<128x128xbf16, #tpu.memory_space<vmem>>, vector<128x128xbf16>
    %cst = arith.constant dense<0.000000e+00> : vector<8x128xf32>
    %2 = tpu.matmul %0, %1, %cst {dimension_numbers = #tpu.dot_dimension_numbers<[1], [0], [0], [1], [0, 0, 1, 1], [], []>} : vector<8x128xbf16>, vector<128x128xbf16>, vector<8x128xf32> -> vector<8x128xf32>
    %c0_3 = arith.constant 0 : index
    %c0_4 = arith.constant 0 : index
    %3 = vector.load %arg3[%c0_3, %c0_4] : memref<1x128xf32, #tpu.memory_space<vmem>>, vector<1x128xf32>
    %4 = vector.broadcast %3 : vector<1x128xf32> to vector<8x128xf32>
    %5 = arith.addf %2, %4 : vector<8x128xf32>
    %cst_5 = arith.constant 0.000000e+00 : f32
    %6 = vector.broadcast %cst_5 : f32 to vector<8x128xf32>
    %7 = arith.maximumf %5, %6 : vector<8x128xf32>
    %8 = arith.truncf %7 : vector<8x128xf32> to vector<8x128xbf16>
    %c0_6 = arith.constant 0 : index
    %c0_7 = arith.constant 0 : index
    %9 = vector.load %arg4[%c0_6, %c0_7] : memref<128x128xbf16, #tpu.memory_space<vmem>>, vector<128x128xbf16>
    %cst_8 = arith.constant dense<0.000000e+00> : vector<8x128xf32>
    %10 = tpu.matmul %8, %9, %cst_8 {dimension_numbers = #tpu.dot_dimension_numbers<[1], [0], [0], [1], [0, 0, 1, 1], [], []>} : vector<8x128xbf16>, vector<128x128xbf16>, vector<8x128xf32> -> vector<8x128xf32>
    %c0_9 = arith.constant 0 : index
    %c0_10 = arith.constant 0 : index
    %11 = vector.load %arg5[%c0_9, %c0_10] : memref<1x128xf32, #tpu.memory_space<vmem>>, vector<1x128xf32>
    %12 = vector.broadcast %11 : vector<1x128xf32> to vector<8x128xf32>
    %13 = arith.addf %10, %12 : vector<8x128xf32>
    %cst_11 = arith.constant 0.000000e+00 : f32
    %14 = vector.broadcast %cst_11 : f32 to vector<8x128xf32>
    %15 = arith.maximumf %13, %14 : vector<8x128xf32>
    %16 = arith.truncf %15 : vector<8x128xf32> to vector<8x128xbf16>
    %c0_12 = arith.constant 0 : index
    %c0_13 = arith.constant 0 : index
    %17 = vector.load %arg6[%c0_12, %c0_13] : memref<128x256xbf16, #tpu.memory_space<vmem>>, vector<128x256xbf16>
    %cst_14 = arith.constant dense<0.000000e+00> : vector<8x256xf32>
    %18 = tpu.matmul %16, %17, %cst_14 {dimension_numbers = #tpu.dot_dimension_numbers<[1], [0], [0], [1], [0, 0, 1, 1], [], []>} : vector<8x128xbf16>, vector<128x256xbf16>, vector<8x256xf32> -> vector<8x256xf32>
    %c0_15 = arith.constant 0 : index
    %c0_16 = arith.constant 0 : index
    %19 = vector.load %arg7[%c0_15, %c0_16] : memref<1x256xf32, #tpu.memory_space<vmem>>, vector<1x256xf32>
    %20 = vector.broadcast %19 : vector<1x256xf32> to vector<8x256xf32>
    %21 = arith.addf %18, %20 : vector<8x256xf32>
    %22 = vector.extract_strided_slice %21 {offsets = [0, 0], sizes = [8, 128], strides = [1, 1]} : vector<8x256xf32> to vector<8x128xf32>
    %c0_17 = arith.constant 0 : index
    %c0_18 = arith.constant 0 : index
    %23 = vector.load %arg8[%c0_17, %c0_18] : memref<8x128xf32, #tpu.memory_space<vmem>>, vector<8x128xf32>
    tpu.vector_store %arg8[%c0_17, %c0_18], %22 {strides = array<i32>} : memref<8x128xf32, #tpu.memory_space<vmem>>, vector<8x128xf32>,
    %24 = vector.extract_strided_slice %21 {offsets = [0, 128], sizes = [8, 128], strides = [1, 1]} : vector<8x256xf32> to vector<8x128xf32>
    %cst_19 = arith.constant -2.000000e+01 : f32
    %cst_20 = arith.constant 2.000000e+00 : f32
    %25 = vector.broadcast %cst_19 : f32 to vector<8x128xf32>
    %26 = arith.maximumf %25, %24 : vector<8x128xf32>
    %27 = vector.broadcast %cst_20 : f32 to vector<8x128xf32>
    %28 = arith.minimumf %27, %26 : vector<8x128xf32>
    %29 = math.exp %28 : vector<8x128xf32>
    %c0_21 = arith.constant 0 : index
    %c0_22 = arith.constant 0 : index
    %30 = vector.load %arg9[%c0_21, %c0_22] : memref<8x128xf32, #tpu.memory_space<vmem>>, vector<8x128xf32>
    tpu.vector_store %arg9[%c0_21, %c0_22], %29 {strides = array<i32>} : memref<8x128xf32, #tpu.memory_space<vmem>>, vector<8x128xf32>,
    return
  }
  func.func @transform_0(%arg0: i32) -> (i32, i32) {
    %c0_i32 = arith.constant 0 : i32
    %c0_i32_0 = arith.constant 0 : i32
    return %arg0, %c0_i32 : i32, i32
  }
  func.func @transform_1(%arg0: i32) -> (i32, i32) {
    %c0_i32 = arith.constant 0 : i32
    %c0_i32_0 = arith.constant 0 : i32
    %c0_i32_1 = arith.constant 0 : i32
    return %c0_i32, %c0_i32_0 : i32, i32
  }
  func.func @transform_2(%arg0: i32) -> (i32, i32) {
    %c0_i32 = arith.constant 0 : i32
    %c0_i32_0 = arith.constant 0 : i32
    %c0_i32_1 = arith.constant 0 : i32
    return %c0_i32, %c0_i32_0 : i32, i32
  }
  func.func @transform_3(%arg0: i32) -> (i32, i32) {
    %c0_i32 = arith.constant 0 : i32
    %c0_i32_0 = arith.constant 0 : i32
    %c0_i32_1 = arith.constant 0 : i32
    return %c0_i32, %c0_i32_0 : i32, i32
  }
  func.func @transform_4(%arg0: i32) -> (i32, i32) {
    %c0_i32 = arith.constant 0 : i32
    %c0_i32_0 = arith.constant 0 : i32
    %c0_i32_1 = arith.constant 0 : i32
    return %c0_i32, %c0_i32_0 : i32, i32
  }
  func.func @transform_5(%arg0: i32) -> (i32, i32) {
    %c0_i32 = arith.constant 0 : i32
    %c0_i32_0 = arith.constant 0 : i32
    %c0_i32_1 = arith.constant 0 : i32
    return %c0_i32, %c0_i32_0 : i32, i32
  }
  func.func @transform_6(%arg0: i32) -> (i32, i32) {
    %c0_i32 = arith.constant 0 : i32
    %c0_i32_0 = arith.constant 0 : i32
    %c0_i32_1 = arith.constant 0 : i32
    return %c0_i32, %c0_i32_0 : i32, i32
  }
  func.func @transform_7(%arg0: i32) -> (i32, i32) {
    %c0_i32 = arith.constant 0 : i32
    %c0_i32_0 = arith.constant 0 : i32
    return %arg0, %c0_i32 : i32, i32
  }
  func.func @transform_8(%arg0: i32) -> (i32, i32) {
    %c0_i32 = arith.constant 0 : i32
    %c0_i32_0 = arith.constant 0 : i32
    return %arg0, %c0_i32 : i32, i32
  }
}

</mosaic_0001>

<bundles_post_ra>
// kernel: tpu_custom_call.1
= control target key start
LH: loop header
LB: loop body
LE: loop exit
PB: predicated region body
PF: predicated region fallthrough
CT: control target
= control target key end

     0   :  { %14 = vsyncpa [#allocation3], 0  ;;  %s931_s0 = inlined_call_operand.hbm [shape: bf16[8,128], index: 0, kind: input, shape index: {}]   ;;  %s932_s1 = inlined_call_operand.hbm [shape: bf16[128,128], index: 1, kind: input, shape index: {}]   ;;  %s933_s2 = inlined_call_operand.vmem [shape: f32[1,128], index: 2, kind: input, shape index: {}]   ;;  %s934_s3 = inlined_call_operand.hbm [shape: bf16[128,128], index: 3, kind: input, shape index: {}]   ;;  %s935_s4 = inlined_call_operand.vmem [shape: f32[1,128], index: 4, kind: input, shape index: {}]   ;;  %s936_s5 = inlined_call_operand.hbm [shape: bf16[128,256], index: 5, kind: input, shape index: {}]   ;;  %s937_s6 = inlined_call_operand.vmem [shape: f32[1,256], index: 6, kind: input, shape index: {}]   ;;  %s938_s7 = inlined_call_operand.hbm [shape: f32[8,128], index: 7, kind: output, shape index: {0}]   ;;  %s939_s8 = inlined_call_operand.hbm [shape: f32[8,128], index: 8, kind: output, shape index: {1}]  }
   0x1   :  { %15 = vsyncpa [#allocation6], 0 }
   0x2   :  { %16 = vsyncpa [#allocation9], 0 }
   0x3   :  { %17 = vsyncpa [#allocation4], 0 }
   0x4   :  { %18 = vsyncpa [#allocation12], 0  ;;  %s786_s27 = smov [#allocation5]   ;;  %s644_s9 = scalar_lea.hbm %s932_s1, 1024 }
   0x5   :  { %s34_s28 = sshll.u32 %s786_s27, 4  ;;  %p645_p0 = scmp.ne.s32.totalorder %s932_s1, %s644_s9  ;;  %s35_s28 = int_to_ptr.vmem [resolvable:$true] %s34_s28 }
   0x6   :  { %p648_p1 = scmp.lt.u32.totalorder %s644_s9, %s932_s1 }
   0x8   :  { %p650_p2 = pnand %p648_p1, %p645_p0 }
   0xa   :  { %653 = shalt.err (!%p650_p2)
}
   0xb   :  { %s654_s14 = scalar_lea.vmem %s35_s28, 1024  ;;  %p659_p4 = scmp.lt.s32.totalorder %s35_s28, %s35_s28 }
   0xc   :  { %p655_p3 = scmp.ne.s32.totalorder %s35_s28, %s654_s14  ;;  %p660_p5 = scmp.lt.s32.totalorder %s654_s14, %s654_s14 }
   0xe   :  { %p661_p6 = por %p660_p5, %p659_p4 }
  0x10   :  { %p662_p7 = pnand %p661_p6, %p655_p3 }
  0x12   :  { %665 = shalt.err (!%p662_p7)
}
  0x13   :  { %s787_s15 = smov 64   ;;  %s788_s16 = smov 4  }
  0x14   :  { %40 = dma.hbm_to_vmem [thread:$0]  %s932_s1, 1024, %s35_s28, [#allocation6], %s787_s15, %s787_s15, %s788_s16  }
  0x15   :  { %s789_s19 = smov [#allocation2]   ;;  %s790_s21 = smov [#allocation7]  }
  0x16   :  { %s25_s20 = sshll.u32 %s789_s19, 4  ;;  %s48_s22 = sshll.u32 %s790_s21, 4  ;;  %s26_s20 = int_to_ptr.vmem [resolvable:$true] %s25_s20  ;;  %s49_s22 = int_to_ptr.vmem [resolvable:$true] %s48_s22 }
  0x17   :  { %s666_s25 = scalar_lea.hbm %s931_s0, 64 }
  0x18   :  { %p667_p8 = scmp.ne.s32.totalorder %s931_s0, %s666_s25  ;;  %p670_p9 = scmp.lt.u32.totalorder %s666_s25, %s931_s0 }
  0x1a   :  { %p672_p10 = pnand %p670_p9, %p667_p8 }
  0x1c   :  { %675 = shalt.err (!%p672_p10)
}
  0x1d   :  { %s676_s1 = scalar_lea.vmem %s26_s20, 64  ;;  %p681_p12 = scmp.lt.s32.totalorder %s26_s20, %s26_s20 }
  0x1e   :  { %p677_p11 = scmp.ne.s32.totalorder %s26_s20, %s676_s1  ;;  %p682_p13 = scmp.lt.s32.totalorder %s676_s1, %s676_s1 }
  0x20   :  { %p683_p0 = por %p682_p13, %p681_p12 }
  0x22   :  { %p684_p1 = pnand %p683_p0, %p677_p11 }
  0x24   :  { %687 = shalt.err (!%p684_p1)
}
  0x25   :  { %28 = dma.hbm_to_vmem [thread:$0]  %s931_s0, 64, %s26_s20, [#allocation3]  }
  0x26   :  { %s688_s12 = scalar_lea.hbm %s934_s3, 1024 }
  0x27   :  { %p689_p2 = scmp.ne.s32.totalorder %s934_s3, %s688_s12  ;;  %p692_p3 = scmp.lt.u32.totalorder %s688_s12, %s934_s3 }
  0x29   :  { %p694_p4 = pnand %p692_p3, %p689_p2 }
  0x2b   :  { %697 = shalt.err (!%p694_p4)
}
  0x2c   :  { %s698_s19 = scalar_lea.vmem %s49_s22, 1024  ;;  %p703_p6 = scmp.lt.s32.totalorder %s49_s22, %s49_s22 }
  0x2d   :  { %p699_p5 = scmp.ne.s32.totalorder %s49_s22, %s698_s19  ;;  %p704_p7 = scmp.lt.s32.totalorder %s698_s19, %s698_s19 }
  0x2f   :  { %p705_p8 = por %p704_p7, %p703_p6 }
  0x31   :  { %p706_p9 = pnand %p705_p8, %p699_p5 }
  0x33   :  { %709 = shalt.err (!%p706_p9)
}
  0x34   :  { %54 = dma.hbm_to_vmem [thread:$0]  %s934_s3, 1024, %s49_s22, [#allocation6], %s787_s15, %s787_s15, %s788_s16  }
  0x35   :  { %s791_s21 = smov [#allocation8]   ;;  %s710_s26 = scalar_lea.hbm %s936_s5, 2048 }
  0x36   :  { %s62_s23 = sshll.u32 %s791_s21, 4  ;;  %p711_p10 = scmp.ne.s32.totalorder %s936_s5, %s710_s26  ;;  %s63_s23 = int_to_ptr.vmem [resolvable:$true] %s62_s23 }
  0x37   :  { %p714_p11 = scmp.lt.u32.totalorder %s710_s26, %s936_s5 }
  0x39   :  { %p716_p12 = pnand %p714_p11, %p711_p10 }
  0x3b   :  { %719 = shalt.err (!%p716_p12)
}
  0x3c   :  { %s720_s28 = scalar_lea.vmem %s63_s23, 2048  ;;  %p725_p0 = scmp.lt.s32.totalorder %s63_s23, %s63_s23 }
  0x3d   :  { %p721_p13 = scmp.ne.s32.totalorder %s63_s23, %s720_s28  ;;  %p726_p1 = scmp.lt.s32.totalorder %s720_s28, %s720_s28 }
  0x3f   :  { %p727_p2 = por %p726_p1, %p725_p0 }
  0x41   :  { %p728_p3 = pnand %p727_p2, %p721_p13 }
  0x43   :  { %731 = shalt.err (!%p728_p3)
}
  0x44   :  { %s792_s3 = smov 128   ;;  %s793_s15 = smov 8  }
  0x45   :  { %68 = dma.hbm_to_vmem [thread:$0]  %s936_s5, 2048, %s63_s23, [#allocation9], %s792_s3, %s792_s3, %s793_s15  }
  0x46   :  { %776 = dma.done.wait [#allocation3], 64  }
  0x47   :  { %777 = vsyncadd [#allocation3], 4294967232 }
  0x48   :  { %778 = dma.done.wait [#allocation6], 2048  }
  0x49   :  { %779 = vsyncadd [#allocation6], 4294965248 }
  0x4a   :  { %780 = dma.done.wait [#allocation9], 2048  }
  0x4b   :  { %781 = vsyncadd [#allocation9], 4294965248  ;;  %v794_v0 = vmov 0.0   ;;  %vm795_vm0 = vmmov 0   ;;  %v602_v1 = vld [vmem:[#allocation5] sm:$0xff]   ;;  %v603_v2 = vld [vmem:[#allocation5 + $0x8] sm:$0xff]   ;;  %v329_v51 = vlaneseq }
  0x4c   :  { %549 = vmatprep.subr.bf16.mxu0 %v794_v0  ;;  %565 = vmatprep.mubr.msk.bf16.mxu0 %vm795_vm0, %v794_v0  ;;  %v604_v3 = vld [vmem:[#allocation5 + $0x10] sm:$0xff]   ;;  %v610_v4 = vld [vmem:[#allocation7] sm:$0xff]   ;;  %v605_v5 = vld [vmem:[#allocation5 + $0x18] sm:$0xff]   ;;  %v796_v42 = vmov 0   ;;  %s797_s13 = smov [#allocation10]  }
  0x4d   :  { %569 = vmatprep.subr.bf16.mxu1 %v794_v0  ;;  %585 = vmatprep.mubr.msk.bf16.mxu1 %vm795_vm0, %v794_v0  ;;  %v611_v6 = vld [vmem:[#allocation7 + $0x8] sm:$0xff]   ;;  %v606_v7 = vld [vmem:[#allocation5 + $0x20] sm:$0xff]   ;;  %v612_v8 = vld [vmem:[#allocation7 + $0x10] sm:$0xff]   ;;  %v330_v52 = vshrl.u32 %v329_v51, 7 }
  0x4e   :  { %550 = vmatpush3.bf16.msra.mxu0 %v602_v1  ;;  %570 = vmatpush3.bf16.msra.mxu1 %v610_v4  ;;  %v607_v9 = vld [vmem:[#allocation5 + $0x28] sm:$0xff]   ;;  %v613_v10 = vld [vmem:[#allocation7 + $0x18] sm:$0xff]   ;;  %v608_v11 = vld [vmem:[#allocation5 + $0x30] sm:$0xff]  }
  0x4f   :  { %551 = vmatprep.subr.bf16.mxu0 %v794_v0  ;;  %571 = vmatprep.subr.bf16.mxu1 %v794_v0  ;;  %v614_v12 = vld [vmem:[#allocation7 + $0x20] sm:$0xff]   ;;  %v609_v13 = vld [vmem:[#allocation5 + $0x38] sm:$0xff]   ;;  %v615_v14 = vld [vmem:[#allocation7 + $0x28] sm:$0xff]   ;;  %v331_v53 = vsub.s32 0, %v330_v52  ;;  %v335_v55 = vsub.s32 1, %v330_v52 }
  0x50   :  { %v84_v15 = vld [vmem:[#allocation2] sm:$0xf]  ;;  %v616_v16 = vld [vmem:[#allocation7 + $0x30] sm:$0xff]   ;;  %v618_v18 = vld [vmem:[#allocation8] ss:$8 sps:$4 sm:$0xff]  }
  0x51   :  { %v617_v17 = vld [vmem:[#allocation7 + $0x38] sm:$0xff]   ;;  %v620_v19 = vld [vmem:[#allocation8 + $0x4] ss:$8 sps:$4 sm:$0xff]   ;;  %v624_v23 = vld [vmem:[#allocation8 + $0x20] ss:$8 sps:$4 sm:$0xff]  }
  0x52   :  { %552 = vmatpush3.bf16.msra.mxu0 %v603_v2  ;;  %572 = vmatpush3.bf16.msra.mxu1 %v611_v6  ;;  %v623_v20 = vld [vmem:[#allocation8 + $0x14] ss:$8 sps:$4 sm:$0xff]   ;;  %v621_v21 = vld [vmem:[#allocation8 + $0x10] ss:$8 sps:$4 sm:$0xff]   ;;  %v626_v22 = vld [vmem:[#allocation8 + $0x24] ss:$8 sps:$4 sm:$0xff]  }
  0x53   :  { %553 = vmatprep.subr.bf16.mxu0 %v794_v0  ;;  %573 = vmatprep.subr.bf16.mxu1 %v794_v0  ;;  %v629_v24 = vld [vmem:[#allocation8 + $0x34] ss:$8 sps:$4 sm:$0xff]   ;;  %v627_v25 = vld [vmem:[#allocation8 + $0x30] ss:$8 sps:$4 sm:$0xff]   ;;  %v632_v26 = vld [vmem:[#allocation8 + $0x44] ss:$8 sps:$4 sm:$0xff]  }
  0x54   :  { %v630_v27 = vld [vmem:[#allocation8 + $0x40] ss:$8 sps:$4 sm:$0xff]   ;;  %v635_v28 = vld [vmem:[#allocation8 + $0x54] ss:$8 sps:$4 sm:$0xff]   ;;  %v633_v29 = vld [vmem:[#allocation8 + $0x50] ss:$8 sps:$4 sm:$0xff]  }
  0x55   :  { %v638_v30 = vld [vmem:[#allocation8 + $0x64] ss:$8 sps:$4 sm:$0xff]   ;;  %v636_v31 = vld [vmem:[#allocation8 + $0x60] ss:$8 sps:$4 sm:$0xff]   ;;  %v497_v32 = vld [vmem:[%s933_s2] ss:$0 sm:$0xff] }
  0x56   :  { %554 = vmatpush3.bf16.msra.mxu0 %v604_v3  ;;  %574 = vmatpush3.bf16.msra.mxu1 %v612_v8  ;;  %v641_v40 = vld [vmem:[#allocation8 + $0x74] ss:$8 sps:$4 sm:$0xff]   ;;  %v639_v41 = vld [vmem:[#allocation8 + $0x70] ss:$8 sps:$4 sm:$0xff]  }
  0x57   :  { %555 = vmatprep.subr.bf16.mxu0 %v794_v0  ;;  %575 = vmatprep.subr.bf16.mxu1 %v794_v0  ;;  %v506_v43 = vld [vmem:[%s935_s4] ss:$0 sm:$0xff]  ;;  %s472_s4 = sshll.u32 %s797_s13, 4  ;;  %s473_s4 = int_to_ptr.vmem [resolvable:$true] %s472_s4 }
  0x58   :  { %v327_v54 = vld [vmem:[%s937_s6] sm:$0x3]  ;;  %s732_s14 = scalar_lea.vmem %s473_s4, 128  ;;  %p737_p5 = scmp.lt.s32.totalorder %s473_s4, %s473_s4 }
  0x59   :  { %v332_v56 = vrot.slane %v327_v54, %v331_v53  ;;  %v336_v57 = vrot.slane %v327_v54, %v335_v55  ;;  %p733_p4 = scmp.ne.s32.totalorder %s473_s4, %s732_s14  ;;  %p738_p6 = scmp.lt.s32.totalorder %s732_s14, %s732_s14 }
  0x5a   :  { %556 = vmatpush3.bf16.msra.mxu0 %v605_v5  ;;  %576 = vmatpush3.bf16.msra.mxu1 %v613_v10 }
  0x5b   :  { %557 = vmatprep.subr.bf16.mxu0 %v794_v0  ;;  %577 = vmatprep.subr.bf16.mxu1 %v794_v0  ;;  %p739_p7 = por %p738_p6, %p737_p5 }
  0x5d   :  { %p740_p8 = pnand %p739_p7, %p733_p4 }
  0x5e   :  { %558 = vmatpush3.bf16.msra.mxu0 %v606_v7  ;;  %578 = vmatpush3.bf16.msra.mxu1 %v614_v12 }
  0x5f   :  { %559 = vmatprep.subr.bf16.mxu0 %v794_v0  ;;  %579 = vmatprep.subr.bf16.mxu1 %v794_v0 }
  0x62   :  { %560 = vmatpush3.bf16.msra.mxu0 %v607_v9  ;;  %580 = vmatpush3.bf16.msra.mxu1 %v615_v14 }
  0x63   :  { %561 = vmatprep.subr.bf16.mxu0 %v794_v0  ;;  %581 = vmatprep.subr.bf16.mxu1 %v794_v0 }
  0x66   :  { %562 = vmatpush3.bf16.msra.mxu0 %v608_v11  ;;  %582 = vmatpush3.bf16.msra.mxu1 %v616_v16 }
  0x67   :  { %563 = vmatprep.subr.bf16.mxu0 %v794_v0  ;;  %583 = vmatprep.subr.bf16.mxu1 %v794_v0 }
  0x6a   :  { %564 = vmatpush3.bf16.msra.mxu0 %v609_v13  ;;  %584 = vmatpush3.bf16.msra.mxu1 %v617_v17 }
  0x6b   :  { %419 = vmatprep.subr.bf16.mxu0 %v620_v19 }
  0x6d   :  { %566 = vmatmul.mubr.bf16.vlgmr.msra.gmra.mrb[0].mxu0 %v84_v15 }
  0x6e   :  { %420 = vmatpush1.bf16.msra.mxu0 %v618_v18  ;;  %451 = vmatprep.mubr.bf16.mxu0 %v796_v42 }
  0x6f   :  { %421 = vmatprep.subr.bf16.mxu0 %v623_v20 }
  0x72   :  { %422 = vmatpush1.bf16.msra.mxu0 %v621_v21 }
  0x73   :  { %423 = vmatprep.subr.bf16.mxu0 %v626_v22 }
  0x76   :  { %424 = vmatpush1.bf16.msra.mxu0 %v624_v23 }
  0x77   :  { %425 = vmatprep.subr.bf16.mxu0 %v629_v24 }
  0x7a   :  { %426 = vmatpush1.bf16.msra.mxu0 %v627_v25 }
  0x7b   :  { %427 = vmatprep.subr.bf16.mxu0 %v632_v26 }
  0x7e   :  { %428 = vmatpush1.bf16.msra.mxu0 %v630_v27 }
  0x7f   :  { %429 = vmatprep.subr.bf16.mxu0 %v635_v28 }
  0x82   :  { %430 = vmatpush1.bf16.msra.mxu0 %v633_v29 }
  0x83   :  { %431 = vmatprep.subr.bf16.mxu0 %v638_v30 }
  0x86   :  { %432 = vmatpush1.bf16.msra.mxu0 %v636_v31 }
  0x87   :  { %433 = vmatprep.subr.bf16.mxu0 %v641_v40 }
  0x8a   :  { %434 = vmatpush1.bf16.msra.mxu0 %v639_v41 }
 0x140   :  { %v190_v33 = vpop.f32.mrb[0].mxu0 }
 0x141   :  { %v191_v34 = vadd.f32 %v497_v32, %v190_v33  ;;  %v567_v35 = vpop.f32.mrb[1].mxu0 }
 0x142   :  { %v193_v36 = vpop.f32.mrb[2].mxu0 }
 0x143   :  { %v196_v37 = vmax.f32 %v191_v34, 0.0  ;;  %v568_v38 = vpop.f32.mrb[3].mxu0 }
 0x145   :  { %v197_v39 = vpack.c.bf16 %v196_v37, %v196_v37 }
 0x147   :  { %586 = vmatmul.mubr.bf16.vlgmr.msra.gmra.mrb[0].mxu1 %v197_v39 }
 0x21a   :  { %v303_v44 = vpop.f32.mrb[0].mxu1 }
 0x21b   :  { %v304_v45 = vadd.f32 %v506_v43, %v303_v44  ;;  %v587_v46 = vpop.f32.mrb[1].mxu1 }
 0x21c   :  { %v306_v47 = vpop.f32.mrb[2].mxu1 }
 0x21d   :  { %v309_v48 = vmax.f32 %v304_v45, 0.0  ;;  %v588_v49 = vpop.f32.mrb[3].mxu1 }
 0x21f   :  { %v310_v50 = vpack.c.bf16 %v309_v48, %v309_v48 }
 0x221   :  { %452 = vmatmul.mubr.bf16.vlgmr.msra.gmra.mrb[4].mxu0 %v310_v50 }
 0x2f4   :  { %v453_v58 = vpop.f32.mrb[4].mxu0 }
 0x2f5   :  { %v454_v59 = vadd.f32 %v453_v58, %v332_v56  ;;  %v455_v60 = vpop.f32.mrb[5].mxu0 }
 0x2f6   :  { %v456_v61 = vadd.f32 %v455_v60, %v336_v57  ;;  %v457_v62 = vpop.f32.mrb[6].mxu0 }
 0x2f7   :  { %460 = vst [vmem:[#allocation10] sm:$0xff] %v454_v59  ;;  %v458_v63 = vpop.f32.mrb[7].mxu0 }
 0x2f8   :  { %v461_v0 = vmax.f32 %v456_v61, -20.0 }
 0x2f9   :  { %743 = shalt.err (!%p740_p8)
}
 0x2fa   :  { %s744_s18 = scalar_lea.hbm %s938_s7, 128 }
 0x2fb   :  { %p745_p9 = scmp.ne.s32.totalorder %s938_s7, %s744_s18  ;;  %p748_p10 = scmp.lt.u32.totalorder %s744_s18, %s938_s7 }
 0x2fd   :  { %p750_p11 = pnand %p748_p10, %p745_p9 }
 0x2ff   :  { %753 = shalt.err (!%p750_p11)
}
 0x300   :  { %475 = dma.vmem_to_hbm [thread:$0]  %s473_s4, 128, %s938_s7, [#allocation4]   ;;  %v462_v1 = vmin.f32 %v461_v0, 2.0 }
 0x301   :  { %s798_s25 = smov [#allocation11]  }
 0x302   :  { %v463_v2 = vmul.f32 1.442695, %v462_v1  ;;  %s482_s26 = sshll.u32 %s798_s25, 4  ;;  %s483_s26 = int_to_ptr.vmem [resolvable:$true] %s482_s26 }
 0x303   :  { %s754_s27 = scalar_lea.vmem %s483_s26, 128  ;;  %p759_p13 = scmp.lt.s32.totalorder %s483_s26, %s483_s26 }
 0x304   :  { %642 = vpow2.f32 %v463_v2  ;;  %p755_p12 = scmp.ne.s32.totalorder %s483_s26, %s754_s27  ;;  %p760_p0 = scmp.lt.s32.totalorder %s754_s27, %s754_s27 }
 0x306   :  { %p761_p1 = por %p760_p0, %p759_p13 }
 0x308   :  { %p762_p2 = pnand %p761_p1, %p755_p12 }
 0x30e   :  { %v643_v3 = vpop.eup %642 }
 0x30f   :  { %465 = vst [vmem:[#allocation11] sm:$0xff] %v643_v3 }
 0x310   :  { %765 = shalt.err (!%p762_p2)
}
 0x311   :  { %s766_s1 = scalar_lea.hbm %s939_s8, 128 }
 0x312   :  { %p767_p3 = scmp.ne.s32.totalorder %s939_s8, %s766_s1  ;;  %p770_p4 = scmp.lt.u32.totalorder %s766_s1, %s939_s8 }
 0x314   :  { %p772_p5 = pnand %p770_p4, %p767_p3 }
 0x316   :  { %775 = shalt.err (!%p772_p5)
}
 0x317   :  { %485 = dma.vmem_to_hbm [thread:$0]  %s483_s26, 128, %s939_s8, [#allocation12]  }
 0x318   :  { %782 = dma.done.wait [#allocation4], 128  }
 0x319   :  { %783 = vsyncadd [#allocation4], 4294967168 }
 0x31a   :  { %784 = dma.done.wait [#allocation12], 128  }
 0x31b   :  { %785 = vsyncadd [#allocation12], 4294967168 }
 0x31c   :  { %492 = vsyncpa [#allocation3], 1 }
 0x31d   :  { %493 = vsyncpa [#allocation6], 1 }
 0x31e   :  { %494 = vsyncpa [#allocation9], 1 }
 0x31f   :  { %495 = vsyncpa [#allocation4], 1 }
 0x320   :  { %496 = vsyncpa [#allocation12], 1 }

</bundles_post_ra>
